<compile_context>
chip_gen: v6e
topology: v6e:2x2x1
jax: 0.10.0
libtpu: 0.0.40
codegen_flags: <defaults>
</compile_context>

<pallas_src>
import functools

import jax
import jax.numpy as jnp
from jax.experimental import pallas as pl
from jax.experimental.pallas import tpu as pltpu


def _round_up(x, m):
    return -(-x // m) * m


def _guess_num_tensorcores():
    try:
        info = pltpu.get_tpu_info()
    except Exception:
        return 1
    for attr in ("num_tensorcores", "tensorcore_count", "num_cores", "core_count"):
        v = getattr(info, attr, None)
        if isinstance(v, int) and v > 0:
            return v
    return 1


def _vmem_capacity_bytes():
    try:
        v = int(pltpu.get_tpu_info().vmem_capacity_bytes)
        if v > 0:
            return v
    except Exception:
        pass
    return 64 * 1024 * 1024  # conservative default: v7x per-TensorCore VMEM


def _tversky_stats_kernel(logits_ref, targets_ref, stats_ref, *, n_rows,
                          blocks_per_split):
    """Accumulates per-class [tp, sum_preds] into rows 0..1 of stats_ref."""
    s = pl.program_id(0)
    i = pl.program_id(1)

    @pl.when(i == 0)
    def _():
        stats_ref[...] = jnp.zeros_like(stats_ref)

    bn, c = logits_ref.shape

    # Row-validity mask from the LOGICAL block index (the last block may be
    # partially out of bounds, and phantom trailing blocks of a split are
    # clamped by the index_map to a real block -> mask zeroes them out).
    row0 = (s * blocks_per_split + i) * bn
    row_ids = jax.lax.broadcasted_iota(jnp.int32, (bn, 1), 0) + row0
    valid = row_ids < n_rows                                   # (bn, 1) bool
    validf = valid.astype(jnp.float32)

    # Softmax over the full class dim. Out-of-bounds rows hold undefined data,
    # so force them to 0 BEFORE exp (no inf/nan can leak); they are then
    # removed by the valid-mask LHS of the column-sum matmuls.
    x = logits_ref[...].astype(jnp.float32)                    # (bn, C)
    x = jnp.where(valid, x, 0.0)
    x_max = jnp.max(x, axis=-1, keepdims=True)
    e = jnp.exp(x - x_max)
    denom = jnp.sum(e, axis=-1, keepdims=True)                 # (bn, 1)
    preds = e * pl.reciprocal(denom, approx=False)             # (bn, C)

    # One-hot from a (1, C) iota broadcast against (bn, 1) targets (no full
    # (bn, C) iota tile per step). Garbage targets in padded rows may alias
    # real class ids, but those rows are zero-weighted by the matmul LHS.
    tgt = targets_ref[...]                                     # (bn, 1) int32
    class_ids = jax.lax.broadcasted_iota(jnp.int32, (1, c), 1)
    onehot = (class_ids == tgt).astype(jnp.float32)            # (bn, C)

    # Column reductions on the MXU; row-valid mask folded into the LHS, so no
    # full-tile preds*valid multiply is needed.
    lhs = validf.reshape(1, bn)                                # (1, bn)
    sp = jnp.dot(lhs, preds, preferred_element_type=jnp.float32)            # (1, C)
    tp = jnp.dot(lhs, preds * onehot, preferred_element_type=jnp.float32)   # (1, C)

    stats_ref[0:1, :] += tp
    stats_ref[1:2, :] += sp


def tversky_loss(logits, targets, *, alpha, beta, smooth=1e-6,
                 block_rows=None, num_row_splits=None):
    """Pallas TverskyLoss forward. logits: (N, C) float, targets: (N,) int."""
    n, c = logits.shape
    itemsize = jnp.dtype(logits.dtype).itemsize
    targets = targets.astype(jnp.int32)

    # Generation-aware VMEM limit (v7x: 64 MiB/TC, v5e/v6e: 128 MiB), with
    # ~16 MiB headroom so the bigger tiles don't flip into a spill regime.
    vmem_cap = _vmem_capacity_bytes()
    vmem_limit = max(32 * 1024 * 1024,
                     min(vmem_cap - 16 * 1024 * 1024, 100 * 1024 * 1024))

    # Honest per-row VMEM accounting:
    #   2 * C * itemsize   double-buffered logits input
    #   4 * C * 4          f32 temporaries at reduction boundaries (x/e/preds/masked)
    #   2 * 128 * 4        (bn, 1) int32 targets block, lane-padded to (bn, 128), x2 buffers
    per_row = 2 * c * itemsize + 4 * c * 4 + 2 * 128 * 4
    tile_budget = (vmem_limit * 3) // 5
    max_bn = max(8, (tile_budget // per_row) // 8 * 8)

    bn = 8192 if block_rows is None else max(8, (int(block_rows) // 8) * 8)
    bn = min(bn, max_bn, _round_up(n, 8))
    n_blocks = -(-n // bn)

    # Split row blocks across TensorCores (2 on v7x); stays 1 on 1-TC chips.
    if num_row_splits is None:
        splits = _guess_num_tensorcores()
        if n_blocks < 4 * splits:
            splits = 1
    else:
        splits = max(1, int(num_row_splits))
    splits = min(splits, n_blocks)
    bps = -(-n_blocks // splits)
    last_block = n_blocks - 1

    # Clamp phantom trailing blocks (when splits does not divide n_blocks) to
    # the last real block; the in-kernel row mask zeroes their contribution and
    # the pipeline skips the redundant DMA (block index unchanged).
    def logits_map(s, i):
        return (jnp.minimum(s * bps + i, last_block), 0)

    def targets_map(s, i):
        return (jnp.minimum(s * bps + i, last_block), 0)

    kernel = functools.partial(_tversky_stats_kernel, n_rows=n,
                               blocks_per_split=bps)

    cost = pl.CostEstimate(
        flops=10 * n * c,
        transcendentals=n * c,
        bytes_accessed=n * c * itemsize + n * 4 + splits * 8 * c * 4,
    )

    stats = pl.pallas_call(
        kernel,
        out_shape=jax.ShapeDtypeStruct((splits, 8, c), jnp.float32),
        grid_spec=pltpu.PrefetchScalarGridSpec(
            num_scalar_prefetch=0,
            grid=(splits, bps),
            in_specs=[
                pl.BlockSpec((bn, c), logits_map),   # class dim = full array dim
                pl.BlockSpec((bn, 1), targets_map),
            ],
            out_specs=pl.BlockSpec((None, 8, c), lambda s, i: (s, 0, 0)),
        ),
        compiler_params=pltpu.CompilerParams(
            dimension_semantics=("parallel", "arbitrary"),
            vmem_limit_bytes=int(vmem_limit),
        ),
        cost_estimate=cost,
    )(logits, targets.reshape(n, 1))
    # TODO(synk): on v7x, verify the leading "parallel" axis actually shards
    # across both TensorCores (xprof / Mosaic dump); if not, switch that axis
    # to pltpu.CORE_PARALLEL.

    # Combine per-split partials and finish the tiny Tversky math in JAX.
    stats = jnp.sum(stats, axis=0)                     # (8, C)
    tp = stats[0]
    sum_preds = stats[1]
    # Per-class target count: O(N) integer work, done outside the N*C hot loop.
    count = jnp.zeros((c,), jnp.float32).at[targets].add(1.0)
    fp = sum_preds - tp
    fn = count - tp
    ti = (tp + smooth) / (tp + alpha * fp + beta * fn + smooth)
    return jnp.mean(1.0 - ti)


def _reference(logits, targets, alpha, beta, smooth=1e-6):
    preds = jax.nn.softmax(logits.astype(jnp.float32), axis=1)
    onehot = jax.nn.one_hot(targets, logits.shape[1], dtype=jnp.float32)
    tp = jnp.sum(preds * onehot, axis=0)
    fp = jnp.sum(preds * (1.0 - onehot), axis=0)
    fn = jnp.sum((1.0 - preds) * onehot, axis=0)
    ti = (tp + smooth) / (tp + alpha * fp + beta * fn + smooth)
    return jnp.mean(1.0 - ti)


if __name__ == "__main__":
    key = jax.random.PRNGKey(0)
    alpha, beta = 0.3, 0.7
    k1, k2, k3, k4 = jax.random.split(key, 4)

    # Case 1: small canonical shape (N=16 samples, C=8 classes), single block.
    logits = jax.random.normal(k1, (16, 8), dtype=jnp.float32)
    targets = jax.random.randint(k2, (16,), 0, 8, dtype=jnp.int32)
    loss = jax.block_until_ready(
        tversky_loss(logits, targets, alpha=alpha, beta=beta))
    ref = _reference(logits, targets, alpha, beta)
    assert jnp.allclose(loss, ref, atol=1e-5, rtol=1e-5), (loss, ref)

    # Case 2: multi-block with a partial (masked) last block, C=10 with no class
    # padding, and an even 2-way row-block split (4 blocks over 2 splits).
    logits2 = jax.random.normal(k3, (200, 10), dtype=jnp.float32)
    targets2 = jax.random.randint(k4, (200,), 0, 10, dtype=jnp.int32)
    loss2 = jax.block_until_ready(
        tversky_loss(logits2, targets2, alpha=alpha, beta=beta,
                     block_rows=64, num_row_splits=2))
    ref2 = _reference(logits2, targets2, alpha, beta)
    assert jnp.allclose(loss2, ref2, atol=1e-5, rtol=1e-5), (loss2, ref2)

    # Case 3: non-divisible split (3 blocks over 2 splits -> one phantom block),
    # exercising the clamped index_map + in-kernel row-mask path.
    loss3 = jax.block_until_ready(
        tversky_loss(logits2, targets2, alpha=alpha, beta=beta,
                     block_rows=72, num_row_splits=2))
    assert jnp.allclose(loss3, ref2, atol=1e-5, rtol=1e-5), (loss3, ref2)

    print("KERNEL_OK")
</pallas_src>

<mosaic_0001>
module attributes {stable_mosaic.version = 11 : i64} {
  func.func @_tversky_stats_kernel(%arg0: i32, %arg1: i32, %arg2: memref<16x8xf32, #tpu.memory_space<vmem>>, %arg3: memref<16x1xi32, #tpu.memory_space<vmem>>, %arg4: memref<1x8x8xf32, #tpu.memory_space<vmem>>) attributes {dimension_semantics = [#tpu.dimension_semantics<parallel>, #tpu.dimension_semantics<arbitrary>], iteration_bounds = array<i64: 1, 1>, scalar_prefetch = 0 : i64, scratch_operands = 0 : i64, tpu.core_type = #tpu.core_type<tc>, window_params = [{transform_indices = @transform_0, window_bounds = array<i64: 16, 8>}, {transform_indices = @transform_1, window_bounds = array<i64: 16, 1>}, {transform_indices = @transform_2, window_bounds = array<i64: 1, 8, 8>}]} {
    %c0_i32 = arith.constant 0 : i32
    %0 = arith.cmpi eq, %arg1, %c0_i32 : i32
    %1 = arith.extui %0 : i1 to i32
    %c0_i32_0 = arith.constant 0 : i32
    %2 = arith.cmpi ne, %1, %c0_i32_0 : i32
    scf.if %2 {
      %cst_20 = arith.constant 0.000000e+00 : f32
      %51 = vector.broadcast %cst_20 : f32 to vector<8x8xf32>
      %c0_21 = arith.constant 0 : index
      %c0_22 = arith.constant 0 : index
      %c0_23 = arith.constant 0 : index
      %52 = vector.load %arg4[%c0_21, %c0_22, %c0_23] : memref<1x8x8xf32, #tpu.memory_space<vmem>>, vector<1x8x8xf32>
      %53 = vector.shape_cast %52 : vector<1x8x8xf32> to vector<8x8xf32>
      %54 = vector.shape_cast %51 : vector<8x8xf32> to vector<1x8x8xf32>
      tpu.vector_store %arg4[%c0_21, %c0_22, %c0_23], %54 {strides = array<i32>} : memref<1x8x8xf32, #tpu.memory_space<vmem>>, vector<1x8x8xf32>,
    } else {
    }
    %c1_i32 = arith.constant 1 : i32
    %3 = arith.muli %arg0, %c1_i32 : i32
    %4 = arith.addi %3, %arg1 : i32
    %c16_i32 = arith.constant 16 : i32
    %5 = arith.muli %4, %c16_i32 : i32
    %6 = tpu.iota {dimensions = array<i32: 0>} : vector<16x1xi32>
    %7 = vector.broadcast %5 : i32 to vector<16x1xi32>
    %8 = arith.addi %6, %7 : vector<16x1xi32>
    %c16_i32_1 = arith.constant 16 : i32
    %9 = vector.broadcast %c16_i32_1 : i32 to vector<16x1xi32>
    %10 = arith.cmpi slt, %8, %9 : vector<16x1xi32>
    %11 = arith.extui %10 : vector<16x1xi1> to vector<16x1xi32>
    %12 = arith.sitofp %11 : vector<16x1xi32> to vector<16x1xf32>
    %c0 = arith.constant 0 : index
    %c0_2 = arith.constant 0 : index
    %13 = vector.load %arg2[%c0, %c0_2] : memref<16x8xf32, #tpu.memory_space<vmem>>, vector<16x8xf32>
    %cst = arith.constant 0.000000e+00 : f32
    %14 = vector.shape_cast %10 : vector<16x1xi1> to vector<16x1xi1>
    %15 = vector.broadcast %14 : vector<16x1xi1> to vector<16x8xi1>
    %16 = vector.broadcast %cst : f32 to vector<16x8xf32>
    %17 = arith.select %15, %13, %16 : vector<16x8xi1>, vector<16x8xf32>
    %cst_3 = arith.constant dense<0xFF800000> : vector<16xf32>
    %18 = vector.multi_reduction <maximumf>, %17, %cst_3 [1] : vector<16x8xf32> to vector<16xf32>
    %19 = vector.shape_cast %18 : vector<16xf32> to vector<16x1xf32>
    %20 = vector.broadcast %19 : vector<16x1xf32> to vector<16x8xf32>
    %21 = arith.subf %17, %20 : vector<16x8xf32>
    %22 = math.exp %21 : vector<16x8xf32>
    %cst_4 = arith.constant dense<0.000000e+00> : vector<16xf32>
    %23 = vector.multi_reduction <add>, %22, %cst_4 [1] : vector<16x8xf32> to vector<16xf32>
    %24 = vector.shape_cast %23 : vector<16xf32> to vector<16x1xf32>
    %25 = tpu.reciprocal %24 : vector<16x1xf32> -> vector<16x1xf32>
    %26 = vector.broadcast %25 : vector<16x1xf32> to vector<16x8xf32>
    %27 = arith.mulf %22, %26 : vector<16x8xf32>
    %c0_5 = arith.constant 0 : index
    %c0_6 = arith.constant 0 : index
    %28 = vector.load %arg3[%c0_5, %c0_6] : memref<16x1xi32, #tpu.memory_space<vmem>>, vector<16x1xi32>
    %29 = tpu.iota {dimensions = array<i32: 1>} : vector<1x8xi32>
    %30 = vector.broadcast %29 : vector<1x8xi32> to vector<16x8xi32>
    %31 = vector.broadcast %28 : vector<16x1xi32> to vector<16x8xi32>
    %32 = arith.cmpi eq, %30, %31 : vector<16x8xi32>
    %33 = arith.extui %32 : vector<16x8xi1> to vector<16x8xi32>
    %34 = arith.sitofp %33 : vector<16x8xi32> to vector<16x8xf32>
    %35 = vector.shape_cast %12 : vector<16x1xf32> to vector<1x16xf32>
    %cst_7 = arith.constant dense<0.000000e+00> : vector<1x8xf32>
    %36 = tpu.matmul %35, %27, %cst_7 {dimension_numbers = #tpu.dot_dimension_numbers<[1], [0], [0], [1], [0, 0, 1, 1], [], []>} : vector<1x16xf32>, vector<16x8xf32>, vector<1x8xf32> -> vector<1x8xf32>
    %37 = arith.mulf %27, %34 : vector<16x8xf32>
    %cst_8 = arith.constant dense<0.000000e+00> : vector<1x8xf32>
    %38 = tpu.matmul %35, %37, %cst_8 {dimension_numbers = #tpu.dot_dimension_numbers<[1], [0], [0], [1], [0, 0, 1, 1], [], []>} : vector<1x16xf32>, vector<16x8xf32>, vector<1x8xf32> -> vector<1x8xf32>
    %c0_9 = arith.constant 0 : index
    %c0_10 = arith.constant 0 : index
    %c0_11 = arith.constant 0 : index
    %39 = vector.load %arg4[%c0_9, %c0_10, %c0_11] : memref<1x8x8xf32, #tpu.memory_space<vmem>>, vector<1x1x8xf32>
    %40 = vector.shape_cast %39 : vector<1x1x8xf32> to vector<1x8xf32>
    %41 = arith.addf %40, %38 : vector<1x8xf32>
    %c0_12 = arith.constant 0 : index
    %c0_13 = arith.constant 0 : index
    %c0_14 = arith.constant 0 : index
    %42 = vector.load %arg4[%c0_12, %c0_13, %c0_14] : memref<1x8x8xf32, #tpu.memory_space<vmem>>, vector<1x1x8xf32>
    %43 = vector.shape_cast %42 : vector<1x1x8xf32> to vector<1x8xf32>
    %44 = vector.shape_cast %41 : vector<1x8xf32> to vector<1x1x8xf32>
    tpu.vector_store %arg4[%c0_12, %c0_13, %c0_14], %44 {strides = array<i32>} : memref<1x8x8xf32, #tpu.memory_space<vmem>>, vector<1x1x8xf32>,
    %c0_15 = arith.constant 0 : index
    %c1 = arith.constant 1 : index
    %c0_16 = arith.constant 0 : index
    %45 = vector.load %arg4[%c0_15, %c1, %c0_16] : memref<1x8x8xf32, #tpu.memory_space<vmem>>, vector<1x1x8xf32>
    %46 = vector.shape_cast %45 : vector<1x1x8xf32> to vector<1x8xf32>
    %47 = arith.addf %46, %36 : vector<1x8xf32>
    %c0_17 = arith.constant 0 : index
    %c1_18 = arith.constant 1 : index
    %c0_19 = arith.constant 0 : index
    %48 = vector.load %arg4[%c0_17, %c1_18, %c0_19] : memref<1x8x8xf32, #tpu.memory_space<vmem>>, vector<1x1x8xf32>
    %49 = vector.shape_cast %48 : vector<1x1x8xf32> to vector<1x8xf32>
    %50 = vector.shape_cast %47 : vector<1x8xf32> to vector<1x1x8xf32>
    tpu.vector_store %arg4[%c0_17, %c1_18, %c0_19], %50 {strides = array<i32>} : memref<1x8x8xf32, #tpu.memory_space<vmem>>, vector<1x1x8xf32>,
    return
  }
  func.func @transform_0(%arg0: i32, %arg1: i32) -> (i32, i32) {
    %c1_i32 = arith.constant 1 : i32
    %0 = arith.muli %arg0, %c1_i32 : i32
    %1 = arith.addi %0, %arg1 : i32
    %c0_i32 = arith.constant 0 : i32
    %2 = arith.minsi %1, %c0_i32 : i32
    %c0_i32_0 = arith.constant 0 : i32
    %c0_i32_1 = arith.constant 0 : i32
    return %2, %c0_i32_0 : i32, i32
  }
  func.func @transform_1(%arg0: i32, %arg1: i32) -> (i32, i32) {
    %c1_i32 = arith.constant 1 : i32
    %0 = arith.muli %arg0, %c1_i32 : i32
    %1 = arith.addi %0, %arg1 : i32
    %c0_i32 = arith.constant 0 : i32
    %2 = arith.minsi %1, %c0_i32 : i32
    %c0_i32_0 = arith.constant 0 : i32
    %c0_i32_1 = arith.constant 0 : i32
    return %2, %c0_i32_0 : i32, i32
  }
  func.func @transform_2(%arg0: i32, %arg1: i32) -> (i32, i32, i32) {
    %c0_i32 = arith.constant 0 : i32
    %c0_i32_0 = arith.constant 0 : i32
    %c0_i32_1 = arith.constant 0 : i32
    return %arg0, %c0_i32, %c0_i32_0 : i32, i32, i32
  }
}

</mosaic_0001>

<bundles_post_ra>
// kernel: tpu_custom_call.1
= control target key start
LH: loop header
LB: loop body
LE: loop exit
PB: predicated region body
PF: predicated region fallthrough
CT: control target
= control target key end

     0   :  { %vm80_vm0 = vcmask 64512   ;;  %s433_s0 = inlined_call_operand.vmem [shape: f32[16,8], index: 0, kind: input, shape index: {}]   ;;  %s434_s1 = inlined_call_operand.vmem [shape: s32[16,1], index: 1, kind: input, shape index: {}]   ;;  %s435_s2 = inlined_call_operand.hbm [shape: f32[1,8,8], index: 2, kind: output, shape index: {}]  }
   0x1   :  { %v97_v0 = vld [vmem:[%s433_s0 + $0x8] sm:$0xff]  ;;  %v96_v1 = vld [vmem:[%s433_s0] sm:$0xff] }
   0x2   :  { %7 = vsyncpa [#allocation3], 0  ;;  %v106_v2 = vsel %vm80_vm0, %v97_v0, -inf  ;;  %v103_v3 = vsel %vm80_vm0, %v96_v1, -inf  ;;  %v126_v4 = vld [vmem:[%s434_s1 + $0x8] sm:$0xff]  ;;  %v393_v5 = vmov 0   ;;  %v127_v18 = vlaneseq }
   0x3   :  { %107 = vmax.xlane.f32.xlu0 %v106_v2  ;;  %362 = vset.pattern.permute.xlu1 %v393_v5  ;;  %v394_v16 = vmov 0.0   ;;  %v125_v17 = vld [vmem:[%s434_s1] sm:$0xff]  ;;  %vm395_vm1 = vmmov 0   ;;  %v396_v31 = vmov 1.0   ;;  %vm152_vm4 = vcmask 130112   ;;  %s397_s1 = smov [#allocation2]  }
   0x4   :  { %361 = vset.pattern.permute.xlu0 %v393_v5  ;;  %81 = vst.msk [vmem:[#allocation2] sm:$0xff] %vm80_vm0, %v394_v16  ;;  %342 = vmatprep.subr.mxu0 %v394_v16  ;;  %v128_v20 = vand.u32 127, %v127_v18  ;;  %v144_v22 = vshrl.u32 %v127_v18, 7  ;;  %vm154_vm5 = vcmask 130048   ;;  %vm301_vm6 = vcmask 57344   ;;  %s312_s16 = sshll.u32 %s397_s1, 4  ;;  %s313_s16 = int_to_ptr.vmem [resolvable:$true] %s312_s16 }
   0x5   :  { %349 = vmatprep.subr.mxu1 %v394_v16  ;;  %346 = vmatprep.mubr.msk.f32.mxu0 %vm395_vm1, %v394_v16  ;;  %s371_s17 = scalar_lea.vmem %s313_s16, 128  ;;  %p376_p1 = scmp.lt.s32.totalorder %s313_s16, %s313_s16 }
   0x6   :  { %353 = vmatprep.mubr.msk.f32.mxu1 %vm395_vm1, %v394_v16  ;;  %v147_v23 = vadd.s32 4294967288, %v128_v20  ;;  %v145_v25 = vsub.s32 %v128_v20, %v144_v22  ;;  %p372_p0 = scmp.ne.s32.totalorder %s313_s16, %s371_s17  ;;  %p377_p2 = scmp.lt.s32.totalorder %s371_s17, %s371_s17 }
   0x7   :  { %104 = vmax.xlane.f32.xlu0 %v103_v3 }
   0x8   :  { %v150_v26 = vsub.s32 %v147_v23, %v144_v22  ;;  %v146_v32 = vrot.slane %v396_v31, %v145_v25  ;;  %p378_p3 = por %p377_p2, %p376_p1 }
   0xa   :  { %v151_v33 = vrot.slane %v396_v31, %v150_v26  ;;  %p379_p4 = pnand %p378_p3, %p372_p0 }
   0xb   :  { %v303_v40 = vld [vmem:[#allocation2 + $0x1] sm:$0x1]  ;;  %v299_v42 = vld [vmem:[#allocation2] sm:$0x1] }
   0xc   :  { %v153_v38 = vsel %vm152_vm4, %v151_v33, %v146_v32 }
  0x1d   :  { %133 = vperm.xlu0 %361, %v126_v4  }
  0x8c   :  { %v108_v6 = vpop.xlane.xlu0 %107 }
  0x8d   :  { %v110_v7 = vsub.f32 %v97_v0, %v108_v6 }
  0x8f   :  { %v113_v8 = vmul.f32 1.442695, %v110_v7 }
  0x90   :  { %v105_v9 = vpop.xlane.xlu0 %104 }
  0x91   :  { %363 = vpow2.f32 %v113_v8  ;;  %v109_v10 = vsub.f32 %v96_v1, %v105_v9 }
  0x93   :  { %v111_v11 = vmul.f32 1.442695, %v109_v10 }
  0x95   :  { %365 = vpow2.f32 %v111_v11 }
  0x98   :  { %v134_v24 = vpop.permute.xlu0 %133 }
  0x99   :  { %vm136_vm2 = vcmp.eq.s32.totalorder %v128_v20, %v134_v24 }
  0x9a   :  { %v333_v29 = vsel %vm136_vm2, 1.0, %v394_v16 }
  0x9e   :  { %v364_v12 = vpop.eup %363 }
  0x9f   :  { %v118_v13 = vsel %vm80_vm0, %v364_v12, 0.0 }
  0xa0   :  { %119 = vadd.xlane.f32.xlu1 %v118_v13 }
  0xa2   :  { %v366_v14 = vpop.eup %365 }
  0xa3   :  { %v115_v15 = vsel %vm80_vm0, %v366_v14, 0.0 }
  0xa4   :  { %116 = vadd.xlane.f32.xlu1 %v115_v15 }
  0xb5   :  { %130 = vperm.xlu1 %362, %v125_v17  }
 0x129   :  { %v120_v19 = vpop.xlane.xlu1 %119 }
 0x12a   :  { %367 = vrcp.f32 %v120_v19 }
 0x12d   :  { %v117_v21 = vpop.xlane.xlu1 %116 }
 0x12e   :  { %369 = vrcp.f32 %v117_v21 }
 0x131   :  { %v131_v27 = vpop.permute.xlu1 %130 }
 0x132   :  { %vm135_vm3 = vcmp.eq.s32.totalorder %v128_v20, %v131_v27 }
 0x133   :  { %v332_v36 = vsel %vm135_vm3, 1.0, %v394_v16 }
 0x137   :  { %v368_v28 = vpop.eup %367 }
 0x138   :  { %v124_v30 = vmul.f32 %v368_v28, %v364_v12 }
 0x13a   :  { %343 = vmatpush3.msra.mxu0 %v124_v30  ;;  %v228_v34 = vmul.f32 %v333_v29, %v124_v30 }
 0x13b   :  { %v370_v35 = vpop.eup %369  ;;  %344 = vmatprep.subr.mxu0 %v394_v16 }
 0x13c   :  { %v123_v37 = vmul.f32 %v370_v35, %v366_v14  ;;  %350 = vmatpush3.msra.mxu1 %v228_v34 }
 0x13d   :  { %351 = vmatprep.subr.mxu1 %v394_v16 }
 0x13e   :  { %v227_v39 = vmul.f32 %v332_v36, %v123_v37  ;;  %345 = vmatpush3.msra.mxu0 %v123_v37 }
 0x13f   :  { %347 = vmatmul.mubr.msk.f32.vlgmr.msra.gmra.mxu0 %vm154_vm5, %v153_v38 }
 0x140   :  { %352 = vmatpush3.msra.mxu1 %v227_v39 }
 0x141   :  { %354 = vmatmul.mubr.msk.f32.vlgmr.msra.gmra.mxu1 %vm154_vm5, %v153_v38 }
 0x1ff   :  { %v223_v41 = vpop.f32.mrf.mxu0 }
 0x200   :  { %v304_v43 = vadd.f32 %v303_v40, %v223_v41 }
 0x201   :  { %v348_v44 = vpop.f32.mrf.mxu0  ;;  %v295_v45 = vpop.f32.mrf.mxu1 }
 0x202   :  { %305 = vst.msk [vmem:[#allocation2 + $0x1] sm:$0x1] %vm301_vm6, %v304_v43  ;;  %v300_v46 = vadd.f32 %v299_v42, %v295_v45 }
 0x203   :  { %v355_v47 = vpop.f32.mrf.mxu1 }
 0x204   :  { %302 = vst.msk [vmem:[#allocation2] sm:$0x1] %vm301_vm6, %v300_v46 }
 0x205   :  { %382 = shalt.err (!%p379_p4)
}
 0x206   :  { %315 = dma.vmem_to_hbm [thread:$0]  %s313_s16, 128, %s435_s2, [#allocation3]  }
 0x207   :  { %391 = dma.done.wait [#allocation3], 128  }
 0x208   :  { %392 = vsyncadd [#allocation3], 4294967168 }
 0x209   :  { %319 = vsyncpa [#allocation3], 1 }

</bundles_post_ra>
